<compile_context>
chip_gen: v7x
topology: tpu7x:2x2x1
jax: 0.10.0
libtpu: 0.0.40
codegen_flags: <defaults>
</compile_context>

<pallas_src>
import numpy as np
import jax
import jax.numpy as jnp
from jax.experimental import pallas as pl
from jax.experimental.pallas import tpu as pltpu

# Problem sizes (match the PyTorch module defaults)
BATCH = 2
INPUT_DIM = 16
OUTPUT_DIM = 4
NUM_ATOMS = 51
HIDDEN = 128
STD_INIT = 0.5

N_LOGITS = OUTPUT_DIM * NUM_ATOMS    # 204 real logits
OUT_PAD = 256                        # lane-dense logit slab (multiple of 128)
NEG_FILL = -1e30                     # exp(padding) == 0 exactly (f32 representable)
SUBLANE = 8


# ---------------------------------------------------------------------------
# Kernel: fc1 -> relu -> fc2 -> relu -> fc3 -> per-action (masked) softmax
# ---------------------------------------------------------------------------
def rainbow_kernel(x_ref, w1_ref, b1_ref, w2_ref, b2_ref, w3_ref, b3_ref, out_ref):
    # bf16 x bf16 MXU matmuls, f32 accumulation, f32 bias + ReLU on the VPU.
    x = x_ref[...].astype(jnp.bfloat16)
    h1 = jnp.dot(x, w1_ref[...], preferred_element_type=jnp.float32) + b1_ref[...]
    h1 = jnp.maximum(h1, 0.0).astype(jnp.bfloat16)

    h2 = jnp.dot(h1, w2_ref[...], preferred_element_type=jnp.float32) + b2_ref[...]
    h2 = jnp.maximum(h2, 0.0).astype(jnp.bfloat16)

    # (TB, 256) lane-dense logits; lanes >= 204 are padding (zero cols, NEG_FILL bias).
    logits = jnp.dot(h2, w3_ref[...], preferred_element_type=jnp.float32) + b3_ref[...]

    # Per-action softmax over 51-atom segments via iota masks (tiny VPU/XLU work
    # that hides under weight DMA); off-segment / padded lanes contribute exactly 0.
    lane = jax.lax.broadcasted_iota(jnp.int32, logits.shape, 1)
    out = jnp.zeros_like(logits)
    for a in range(OUTPUT_DIM):
        mask = (lane >= a * NUM_ATOMS) & (lane < (a + 1) * NUM_ATOMS)
        g = jnp.where(mask, logits, NEG_FILL)
        m = jnp.max(g, axis=-1, keepdims=True)
        e = jnp.exp(g - m)                        # masked lanes -> 0
        s = jnp.sum(e, axis=-1, keepdims=True)
        out = out + e * pl.reciprocal(s)          # exact: distributions sum to 1
    out_ref[...] = out


# ---------------------------------------------------------------------------
# Parameter construction + one-time kernel layout (hoisted OUT of the forward)
# ---------------------------------------------------------------------------
def make_noisy_linear(key, in_features, out_features):
    """Deterministic NoisyLinear params; forward (training) uses mu + sigma*eps."""
    k_wmu, k_bmu, k_weps, k_beps = jax.random.split(key, 4)
    mu_range = 1.0 / np.sqrt(in_features)
    return dict(
        w_mu=jax.random.uniform(k_wmu, (out_features, in_features), jnp.float32,
                                -mu_range, mu_range),
        w_sigma=jnp.full((out_features, in_features),
                         STD_INIT / np.sqrt(in_features), jnp.float32),
        w_eps=jax.random.normal(k_weps, (out_features, in_features), jnp.float32),
        b_mu=jax.random.uniform(k_bmu, (out_features,), jnp.float32,
                                -mu_range, mu_range),
        b_sigma=jnp.full((out_features,), STD_INIT / np.sqrt(out_features),
                         jnp.float32),
        b_eps=jax.random.normal(k_beps, (out_features,), jnp.float32),
    )


def prepare_params(p1, p2, p3):
    """One-time layout: fold mu + sigma*eps (training-mode NoisyLinear) in f32,
    transpose to (in, out), pad fc3 to 256 lanes, cast weights to bf16.
    Runs once per reset_noise() / optimizer step -- NOT per forward."""
    def fold(p):
        w = p["w_mu"] + p["w_sigma"] * p["w_eps"]        # (out, in) f32
        b = p["b_mu"] + p["b_sigma"] * p["b_eps"]        # (out,)
        return w.T, b[None, :]

    w1, b1 = fold(p1)
    w2, b2 = fold(p2)
    w3, b3 = fold(p3)
    pad = OUT_PAD - N_LOGITS
    w3 = jnp.pad(w3, ((0, 0), (0, pad)))                            # zero columns
    b3 = jnp.pad(b3, ((0, 0), (0, pad)), constant_values=NEG_FILL)  # exp(pad) == 0
    return (w1.astype(jnp.bfloat16), b1.astype(jnp.float32),
            w2.astype(jnp.bfloat16), b2.astype(jnp.float32),
            w3.astype(jnp.bfloat16), b3.astype(jnp.float32))
    # TODO(synk): eval-mode forward (mu-only weights) is the same kernel with a
    # differently folded parameter set from prepare_params.


# ---------------------------------------------------------------------------
# Forward wrapper
# ---------------------------------------------------------------------------
def rainbow_forward(x, params):
    """x: (B, INPUT_DIM) f32 -> (B, OUTPUT_DIM, NUM_ATOMS) softmax distributions."""
    w1, b1, w2, b2, w3, b3 = params
    B = x.shape[0]
    b_up8 = -(-B // SUBLANE) * SUBLANE
    # One grid step for small/medium batches; 128-row tiles (dual-TC "parallel")
    # only once each TC can get a full tile.
    tile_b = b_up8 if b_up8 <= 256 else 128
    b_pad = -(-B // tile_b) * tile_b
    x_p = jnp.pad(x, ((0, b_pad - B), (0, 0)))

    inv = lambda i: (0, 0)   # grid-invariant blocks: weights stay VMEM-resident

    out_flat = pl.pallas_call(
        rainbow_kernel,
        out_shape=jax.ShapeDtypeStruct((b_pad, OUT_PAD), jnp.float32),
        grid=(b_pad // tile_b,),
        in_specs=[
            pl.BlockSpec((tile_b, INPUT_DIM), lambda i: (i, 0)),
            pl.BlockSpec((INPUT_DIM, HIDDEN), inv),
            pl.BlockSpec((1, HIDDEN), inv),
            pl.BlockSpec((HIDDEN, HIDDEN), inv),
            pl.BlockSpec((1, HIDDEN), inv),
            pl.BlockSpec((HIDDEN, OUT_PAD), inv),
            pl.BlockSpec((1, OUT_PAD), inv),
        ],
        out_specs=pl.BlockSpec((tile_b, OUT_PAD), lambda i: (i, 0)),
        compiler_params=pltpu.CompilerParams(
            dimension_semantics=("parallel",)),
    )(x_p, w1, b1, w2, b2, w3, b3)

    # Drop batch + lane padding (cheap XLA glue), group atoms per action.
    return out_flat[:B, :N_LOGITS].reshape(B, OUTPUT_DIM, NUM_ATOMS)


# ---------------------------------------------------------------------------
# Pure-JAX reference (matches the PyTorch module in training mode, f32)
# ---------------------------------------------------------------------------
def reference_forward(x, p1, p2, p3):
    def lin(p, h):
        w = p["w_mu"] + p["w_sigma"] * p["w_eps"]
        b = p["b_mu"] + p["b_sigma"] * p["b_eps"]
        return h @ w.T + b
    h = jnp.maximum(lin(p1, x), 0.0)
    h = jnp.maximum(lin(p2, h), 0.0)
    logits = lin(p3, h).reshape(x.shape[0], OUTPUT_DIM, NUM_ATOMS)
    return jax.nn.softmax(logits, axis=2)


if __name__ == "__main__":
    key = jax.random.PRNGKey(0)
    k_x, k1, k2, k3 = jax.random.split(key, 4)

    x = jax.random.normal(k_x, (BATCH, INPUT_DIM), jnp.float32)

    p1 = make_noisy_linear(k1, INPUT_DIM, HIDDEN)
    p2 = make_noisy_linear(k2, HIDDEN, HIDDEN)
    p3 = make_noisy_linear(k3, HIDDEN, OUTPUT_DIM * NUM_ATOMS)

    # One-time layout (fold + transpose + pad + bf16 cast) -- outside the forward.
    params = jax.block_until_ready(prepare_params(p1, p2, p3))

    out = jax.block_until_ready(rainbow_forward(x, params))

    ref = reference_forward(x, p1, p2, p3)
    # Weights are bf16 on the MXU path (f32 accumulation), so logits differ from
    # the f32 reference by O(1e-3); tolerance sized for that.
    np.testing.assert_allclose(np.asarray(out), np.asarray(ref), rtol=2e-2, atol=2e-3)
    # Exact reciprocal path: each action's distribution sums to 1 to f32 precision.
    np.testing.assert_allclose(np.asarray(out.sum(axis=2)),
                               np.ones((BATCH, OUTPUT_DIM)), rtol=0, atol=1e-5)

    print("KERNEL_OK")
</pallas_src>

<mosaic_0001>
module attributes {stable_mosaic.version = 11 : i64} {
  func.func @rainbow_kernel(%arg0: i32, %arg1: memref<8x16xf32, #tpu.memory_space<vmem>>, %arg2: memref<16x128xbf16, #tpu.memory_space<vmem>>, %arg3: memref<1x128xf32, #tpu.memory_space<vmem>>, %arg4: memref<128x128xbf16, #tpu.memory_space<vmem>>, %arg5: memref<1x128xf32, #tpu.memory_space<vmem>>, %arg6: memref<128x256xbf16, #tpu.memory_space<vmem>>, %arg7: memref<1x256xf32, #tpu.memory_space<vmem>>, %arg8: memref<8x256xf32, #tpu.memory_space<vmem>>) attributes {dimension_semantics = [#tpu.dimension_semantics<parallel>], iteration_bounds = array<i64: 1>, scalar_prefetch = 0 : i64, scratch_operands = 0 : i64, tpu.core_type = #tpu.core_type<tc>, window_params = [{transform_indices = @transform_0, window_bounds = array<i64: 8, 16>}, {pipeline_mode = #tpu.pipeline_mode<synchronous>, transform_indices = @transform_1, window_bounds = array<i64: 16, 128>}, {pipeline_mode = #tpu.pipeline_mode<synchronous>, transform_indices = @transform_2, window_bounds = array<i64: 1, 128>}, {pipeline_mode = #tpu.pipeline_mode<synchronous>, transform_indices = @transform_3, window_bounds = array<i64: 128, 128>}, {pipeline_mode = #tpu.pipeline_mode<synchronous>, transform_indices = @transform_4, window_bounds = array<i64: 1, 128>}, {pipeline_mode = #tpu.pipeline_mode<synchronous>, transform_indices = @transform_5, window_bounds = array<i64: 128, 256>}, {pipeline_mode = #tpu.pipeline_mode<synchronous>, transform_indices = @transform_6, window_bounds = array<i64: 1, 256>}, {transform_indices = @transform_7, window_bounds = array<i64: 8, 256>}]} {
    %c0 = arith.constant 0 : index
    %c0_0 = arith.constant 0 : index
    %0 = vector.load %arg1[%c0, %c0_0] : memref<8x16xf32, #tpu.memory_space<vmem>>, vector<8x16xf32>
    %1 = arith.truncf %0 : vector<8x16xf32> to vector<8x16xbf16>
    %c0_1 = arith.constant 0 : index
    %c0_2 = arith.constant 0 : index
    %2 = vector.load %arg2[%c0_1, %c0_2] : memref<16x128xbf16, #tpu.memory_space<vmem>>, vector<16x128xbf16>
    %cst = arith.constant dense<0.000000e+00> : vector<8x128xf32>
    %3 = tpu.matmul %1, %2, %cst {dimension_numbers = #tpu.dot_dimension_numbers<[1], [0], [0], [1], [0, 0, 1, 1], [], []>} : vector<8x16xbf16>, vector<16x128xbf16>, vector<8x128xf32> -> vector<8x128xf32>
    %c0_3 = arith.constant 0 : index
    %c0_4 = arith.constant 0 : index
    %4 = vector.load %arg3[%c0_3, %c0_4] : memref<1x128xf32, #tpu.memory_space<vmem>>, vector<1x128xf32>
    %5 = vector.broadcast %4 : vector<1x128xf32> to vector<8x128xf32>
    %6 = arith.addf %3, %5 : vector<8x128xf32>
    %cst_5 = arith.constant 0.000000e+00 : f32
    %7 = vector.broadcast %cst_5 : f32 to vector<8x128xf32>
    %8 = arith.maximumf %6, %7 : vector<8x128xf32>
    %9 = arith.truncf %8 : vector<8x128xf32> to vector<8x128xbf16>
    %c0_6 = arith.constant 0 : index
    %c0_7 = arith.constant 0 : index
    %10 = vector.load %arg4[%c0_6, %c0_7] : memref<128x128xbf16, #tpu.memory_space<vmem>>, vector<128x128xbf16>
    %cst_8 = arith.constant dense<0.000000e+00> : vector<8x128xf32>
    %11 = tpu.matmul %9, %10, %cst_8 {dimension_numbers = #tpu.dot_dimension_numbers<[1], [0], [0], [1], [0, 0, 1, 1], [], []>} : vector<8x128xbf16>, vector<128x128xbf16>, vector<8x128xf32> -> vector<8x128xf32>
    %c0_9 = arith.constant 0 : index
    %c0_10 = arith.constant 0 : index
    %12 = vector.load %arg5[%c0_9, %c0_10] : memref<1x128xf32, #tpu.memory_space<vmem>>, vector<1x128xf32>
    %13 = vector.broadcast %12 : vector<1x128xf32> to vector<8x128xf32>
    %14 = arith.addf %11, %13 : vector<8x128xf32>
    %cst_11 = arith.constant 0.000000e+00 : f32
    %15 = vector.broadcast %cst_11 : f32 to vector<8x128xf32>
    %16 = arith.maximumf %14, %15 : vector<8x128xf32>
    %17 = arith.truncf %16 : vector<8x128xf32> to vector<8x128xbf16>
    %c0_12 = arith.constant 0 : index
    %c0_13 = arith.constant 0 : index
    %18 = vector.load %arg6[%c0_12, %c0_13] : memref<128x256xbf16, #tpu.memory_space<vmem>>, vector<128x256xbf16>
    %cst_14 = arith.constant dense<0.000000e+00> : vector<8x256xf32>
    %19 = tpu.matmul %17, %18, %cst_14 {dimension_numbers = #tpu.dot_dimension_numbers<[1], [0], [0], [1], [0, 0, 1, 1], [], []>} : vector<8x128xbf16>, vector<128x256xbf16>, vector<8x256xf32> -> vector<8x256xf32>
    %c0_15 = arith.constant 0 : index
    %c0_16 = arith.constant 0 : index
    %20 = vector.load %arg7[%c0_15, %c0_16] : memref<1x256xf32, #tpu.memory_space<vmem>>, vector<1x256xf32>
    %21 = vector.broadcast %20 : vector<1x256xf32> to vector<8x256xf32>
    %22 = arith.addf %19, %21 : vector<8x256xf32>
    %23 = tpu.iota {dimensions = array<i32: 1>} : vector<8x256xi32>
    %cst_17 = arith.constant 0.000000e+00 : f32
    %24 = vector.broadcast %cst_17 : f32 to vector<8x256xf32>
    %c0_i32 = arith.constant 0 : i32
    %25 = vector.broadcast %c0_i32 : i32 to vector<8x256xi32>
    %26 = arith.cmpi sge, %23, %25 : vector<8x256xi32>
    %c51_i32 = arith.constant 51 : i32
    %27 = vector.broadcast %c51_i32 : i32 to vector<8x256xi32>
    %28 = arith.cmpi slt, %23, %27 : vector<8x256xi32>
    %29 = arith.andi %26, %28 : vector<8x256xi1>
    %cst_18 = arith.constant -1.000000e+30 : f32
    %30 = vector.broadcast %cst_18 : f32 to vector<8x256xf32>
    %31 = arith.select %29, %22, %30 : vector<8x256xi1>, vector<8x256xf32>
    %cst_19 = arith.constant dense<0xFF800000> : vector<8xf32>
    %32 = vector.multi_reduction <maximumf>, %31, %cst_19 [1] : vector<8x256xf32> to vector<8xf32>
    %33 = vector.shape_cast %32 : vector<8xf32> to vector<8x1xf32>
    %34 = vector.broadcast %33 : vector<8x1xf32> to vector<8x256xf32>
    %35 = arith.subf %31, %34 : vector<8x256xf32>
    %36 = math.exp %35 : vector<8x256xf32>
    %cst_20 = arith.constant dense<0.000000e+00> : vector<8xf32>
    %37 = vector.multi_reduction <add>, %36, %cst_20 [1] : vector<8x256xf32> to vector<8xf32>
    %38 = vector.shape_cast %37 : vector<8xf32> to vector<8x1xf32>
    %39 = tpu.reciprocal %38 : vector<8x1xf32> -> vector<8x1xf32>
    %40 = vector.broadcast %39 : vector<8x1xf32> to vector<8x256xf32>
    %41 = arith.mulf %36, %40 : vector<8x256xf32>
    %42 = arith.addf %24, %41 : vector<8x256xf32>
    %c51_i32_21 = arith.constant 51 : i32
    %43 = vector.broadcast %c51_i32_21 : i32 to vector<8x256xi32>
    %44 = arith.cmpi sge, %23, %43 : vector<8x256xi32>
    %c102_i32 = arith.constant 102 : i32
    %45 = vector.broadcast %c102_i32 : i32 to vector<8x256xi32>
    %46 = arith.cmpi slt, %23, %45 : vector<8x256xi32>
    %47 = arith.andi %44, %46 : vector<8x256xi1>
    %cst_22 = arith.constant -1.000000e+30 : f32
    %48 = vector.broadcast %cst_22 : f32 to vector<8x256xf32>
    %49 = arith.select %47, %22, %48 : vector<8x256xi1>, vector<8x256xf32>
    %cst_23 = arith.constant dense<0xFF800000> : vector<8xf32>
    %50 = vector.multi_reduction <maximumf>, %49, %cst_23 [1] : vector<8x256xf32> to vector<8xf32>
    %51 = vector.shape_cast %50 : vector<8xf32> to vector<8x1xf32>
    %52 = vector.broadcast %51 : vector<8x1xf32> to vector<8x256xf32>
    %53 = arith.subf %49, %52 : vector<8x256xf32>
    %54 = math.exp %53 : vector<8x256xf32>
    %cst_24 = arith.constant dense<0.000000e+00> : vector<8xf32>
    %55 = vector.multi_reduction <add>, %54, %cst_24 [1] : vector<8x256xf32> to vector<8xf32>
    %56 = vector.shape_cast %55 : vector<8xf32> to vector<8x1xf32>
    %57 = tpu.reciprocal %56 : vector<8x1xf32> -> vector<8x1xf32>
    %58 = vector.broadcast %57 : vector<8x1xf32> to vector<8x256xf32>
    %59 = arith.mulf %54, %58 : vector<8x256xf32>
    %60 = arith.addf %42, %59 : vector<8x256xf32>
    %c102_i32_25 = arith.constant 102 : i32
    %61 = vector.broadcast %c102_i32_25 : i32 to vector<8x256xi32>
    %62 = arith.cmpi sge, %23, %61 : vector<8x256xi32>
    %c153_i32 = arith.constant 153 : i32
    %63 = vector.broadcast %c153_i32 : i32 to vector<8x256xi32>
    %64 = arith.cmpi slt, %23, %63 : vector<8x256xi32>
    %65 = arith.andi %62, %64 : vector<8x256xi1>
    %cst_26 = arith.constant -1.000000e+30 : f32
    %66 = vector.broadcast %cst_26 : f32 to vector<8x256xf32>
    %67 = arith.select %65, %22, %66 : vector<8x256xi1>, vector<8x256xf32>
    %cst_27 = arith.constant dense<0xFF800000> : vector<8xf32>
    %68 = vector.multi_reduction <maximumf>, %67, %cst_27 [1] : vector<8x256xf32> to vector<8xf32>
    %69 = vector.shape_cast %68 : vector<8xf32> to vector<8x1xf32>
    %70 = vector.broadcast %69 : vector<8x1xf32> to vector<8x256xf32>
    %71 = arith.subf %67, %70 : vector<8x256xf32>
    %72 = math.exp %71 : vector<8x256xf32>
    %cst_28 = arith.constant dense<0.000000e+00> : vector<8xf32>
    %73 = vector.multi_reduction <add>, %72, %cst_28 [1] : vector<8x256xf32> to vector<8xf32>
    %74 = vector.shape_cast %73 : vector<8xf32> to vector<8x1xf32>
    %75 = tpu.reciprocal %74 : vector<8x1xf32> -> vector<8x1xf32>
    %76 = vector.broadcast %75 : vector<8x1xf32> to vector<8x256xf32>
    %77 = arith.mulf %72, %76 : vector<8x256xf32>
    %78 = arith.addf %60, %77 : vector<8x256xf32>
    %c153_i32_29 = arith.constant 153 : i32
    %79 = vector.broadcast %c153_i32_29 : i32 to vector<8x256xi32>
    %80 = arith.cmpi sge, %23, %79 : vector<8x256xi32>
    %c204_i32 = arith.constant 204 : i32
    %81 = vector.broadcast %c204_i32 : i32 to vector<8x256xi32>
    %82 = arith.cmpi slt, %23, %81 : vector<8x256xi32>
    %83 = arith.andi %80, %82 : vector<8x256xi1>
    %cst_30 = arith.constant -1.000000e+30 : f32
    %84 = vector.broadcast %cst_30 : f32 to vector<8x256xf32>
    %85 = arith.select %83, %22, %84 : vector<8x256xi1>, vector<8x256xf32>
    %cst_31 = arith.constant dense<0xFF800000> : vector<8xf32>
    %86 = vector.multi_reduction <maximumf>, %85, %cst_31 [1] : vector<8x256xf32> to vector<8xf32>
    %87 = vector.shape_cast %86 : vector<8xf32> to vector<8x1xf32>
    %88 = vector.broadcast %87 : vector<8x1xf32> to vector<8x256xf32>
    %89 = arith.subf %85, %88 : vector<8x256xf32>
    %90 = math.exp %89 : vector<8x256xf32>
    %cst_32 = arith.constant dense<0.000000e+00> : vector<8xf32>
    %91 = vector.multi_reduction <add>, %90, %cst_32 [1] : vector<8x256xf32> to vector<8xf32>
    %92 = vector.shape_cast %91 : vector<8xf32> to vector<8x1xf32>
    %93 = tpu.reciprocal %92 : vector<8x1xf32> -> vector<8x1xf32>
    %94 = vector.broadcast %93 : vector<8x1xf32> to vector<8x256xf32>
    %95 = arith.mulf %90, %94 : vector<8x256xf32>
    %96 = arith.addf %78, %95 : vector<8x256xf32>
    %c0_33 = arith.constant 0 : index
    %c0_34 = arith.constant 0 : index
    %97 = vector.load %arg8[%c0_33, %c0_34] : memref<8x256xf32, #tpu.memory_space<vmem>>, vector<8x256xf32>
    tpu.vector_store %arg8[%c0_33, %c0_34], %96 {strides = array<i32>} : memref<8x256xf32, #tpu.memory_space<vmem>>, vector<8x256xf32>,
    return
  }
  func.func @transform_0(%arg0: i32) -> (i32, i32) {
    %c0_i32 = arith.constant 0 : i32
    %c0_i32_0 = arith.constant 0 : i32
    return %arg0, %c0_i32 : i32, i32
  }
  func.func @transform_1(%arg0: i32) -> (i32, i32) {
    %c0_i32 = arith.constant 0 : i32
    %c0_i32_0 = arith.constant 0 : i32
    %c0_i32_1 = arith.constant 0 : i32
    return %c0_i32, %c0_i32_0 : i32, i32
  }
  func.func @transform_2(%arg0: i32) -> (i32, i32) {
    %c0_i32 = arith.constant 0 : i32
    %c0_i32_0 = arith.constant 0 : i32
    %c0_i32_1 = arith.constant 0 : i32
    return %c0_i32, %c0_i32_0 : i32, i32
  }
  func.func @transform_3(%arg0: i32) -> (i32, i32) {
    %c0_i32 = arith.constant 0 : i32
    %c0_i32_0 = arith.constant 0 : i32
    %c0_i32_1 = arith.constant 0 : i32
    return %c0_i32, %c0_i32_0 : i32, i32
  }
  func.func @transform_4(%arg0: i32) -> (i32, i32) {
    %c0_i32 = arith.constant 0 : i32
    %c0_i32_0 = arith.constant 0 : i32
    %c0_i32_1 = arith.constant 0 : i32
    return %c0_i32, %c0_i32_0 : i32, i32
  }
  func.func @transform_5(%arg0: i32) -> (i32, i32) {
    %c0_i32 = arith.constant 0 : i32
    %c0_i32_0 = arith.constant 0 : i32
    %c0_i32_1 = arith.constant 0 : i32
    return %c0_i32, %c0_i32_0 : i32, i32
  }
  func.func @transform_6(%arg0: i32) -> (i32, i32) {
    %c0_i32 = arith.constant 0 : i32
    %c0_i32_0 = arith.constant 0 : i32
    %c0_i32_1 = arith.constant 0 : i32
    return %c0_i32, %c0_i32_0 : i32, i32
  }
  func.func @transform_7(%arg0: i32) -> (i32, i32) {
    %c0_i32 = arith.constant 0 : i32
    %c0_i32_0 = arith.constant 0 : i32
    return %arg0, %c0_i32 : i32, i32
  }
}

</mosaic_0001>

<bundles_post_ra>
// kernel: tpu_custom_call.1
= control target key start
LH: loop header
LB: loop body
LE: loop exit
PB: predicated region body
PF: predicated region fallthrough
CT: control target
= control target key end

     0   :  { %12 = vsyncpa [#allocation3], 0  ;;  %s907_s0 = inlined_call_operand.hbm [shape: f32[8,16], index: 0, kind: input, shape index: {}]   ;;  %s908_s1 = inlined_call_operand.hbm [shape: bf16[16,128], index: 1, kind: input, shape index: {}]   ;;  %s909_s2 = inlined_call_operand.vmem [shape: f32[1,128], index: 2, kind: input, shape index: {}]   ;;  %s910_s3 = inlined_call_operand.hbm [shape: bf16[128,128], index: 3, kind: input, shape index: {}]   ;;  %s911_s4 = inlined_call_operand.vmem [shape: f32[1,128], index: 4, kind: input, shape index: {}]   ;;  %s912_s5 = inlined_call_operand.hbm [shape: bf16[128,256], index: 5, kind: input, shape index: {}]   ;;  %s913_s6 = inlined_call_operand.vmem [shape: f32[1,256], index: 6, kind: input, shape index: {}]   ;;  %s914_s7 = inlined_call_operand.hbm [shape: f32[8,256], index: 7, kind: output, shape index: {}]  }
   0x1   :  { %13 = vsyncpa [#allocation6], 0 }
   0x2   :  { %14 = vsyncpa [#allocation9], 0 }
   0x3   :  { %15 = vsyncpa [#allocation4], 0  ;;  %s780_s24 = smov [#allocation5]   ;;  %s662_s28 = scalar_lea.hbm %s908_s1, 128 }
   0x4   :  { %s31_s25 = sshll.u32 %s780_s24, 4  ;;  %p663_p0 = scmp.ne.s32.totalorder %s908_s1, %s662_s28  ;;  %s32_s25 = int_to_ptr.vmem [resolvable:$true] %s31_s25 }
   0x5   :  { %p666_p1 = scmp.lt.u32.totalorder %s662_s28, %s908_s1 }
   0x7   :  { %p668_p2 = pnand %p666_p1, %p663_p0 }
   0x9   :  { %671 = shalt.err (!%p668_p2)
}
   0xa   :  { %s672_s10 = scalar_lea.vmem %s32_s25, 128  ;;  %p677_p4 = scmp.lt.s32.totalorder %s32_s25, %s32_s25 }
   0xb   :  { %p673_p3 = scmp.ne.s32.totalorder %s32_s25, %s672_s10  ;;  %p678_p5 = scmp.lt.s32.totalorder %s672_s10, %s672_s10 }
   0xd   :  { %p679_p6 = por %p678_p5, %p677_p4 }
   0xf   :  { %p680_p7 = pnand %p679_p6, %p673_p3 }
  0x11   :  { %683 = shalt.err (!%p680_p7)
}
  0x12   :  { %s781_s11 = smov 64   ;;  %s782_s12 = smov 4  }
  0x13   :  { %37 = dma.hbm_to_vmem [thread:$0]  %s908_s1, 128, %s32_s25, [#allocation6], %s781_s11, %s781_s11, %s782_s12  }
  0x14   :  { %s783_s15 = smov [#allocation2]   ;;  %s784_s17 = smov [#allocation7]  }
  0x15   :  { %s22_s16 = sshll.u32 %s783_s15, 4  ;;  %s45_s18 = sshll.u32 %s784_s17, 4  ;;  %s23_s16 = int_to_ptr.vmem [resolvable:$true] %s22_s16  ;;  %s46_s18 = int_to_ptr.vmem [resolvable:$true] %s45_s18 }
  0x16   :  { %s684_s21 = scalar_lea.hbm %s907_s0, 128 }
  0x17   :  { %p685_p8 = scmp.ne.s32.totalorder %s907_s0, %s684_s21  ;;  %p688_p9 = scmp.lt.u32.totalorder %s684_s21, %s907_s0 }
  0x19   :  { %p690_p10 = pnand %p688_p9, %p685_p8 }
  0x1b   :  { %693 = shalt.err (!%p690_p10)
}
  0x1c   :  { %s694_s1 = scalar_lea.vmem %s23_s16, 128  ;;  %p699_p12 = scmp.lt.s32.totalorder %s23_s16, %s23_s16 }
  0x1d   :  { %p695_p11 = scmp.ne.s32.totalorder %s23_s16, %s694_s1  ;;  %p700_p13 = scmp.lt.s32.totalorder %s694_s1, %s694_s1 }
  0x1f   :  { %p701_p0 = por %p700_p13, %p699_p12 }
  0x21   :  { %p702_p1 = pnand %p701_p0, %p695_p11 }
  0x23   :  { %705 = shalt.err (!%p702_p1)
}
  0x24   :  { %25 = dma.hbm_to_vmem [thread:$0]  %s907_s0, 128, %s23_s16, [#allocation3]  }
  0x25   :  { %s706_s30 = scalar_lea.hbm %s910_s3, 1024 }
  0x26   :  { %p707_p2 = scmp.ne.s32.totalorder %s910_s3, %s706_s30  ;;  %p710_p3 = scmp.lt.u32.totalorder %s706_s30, %s910_s3 }
  0x28   :  { %p712_p4 = pnand %p710_p3, %p707_p2 }
  0x2a   :  { %715 = shalt.err (!%p712_p4)
}
  0x2b   :  { %s716_s14 = scalar_lea.vmem %s46_s18, 1024  ;;  %p721_p6 = scmp.lt.s32.totalorder %s46_s18, %s46_s18 }
  0x2c   :  { %p717_p5 = scmp.ne.s32.totalorder %s46_s18, %s716_s14  ;;  %p722_p7 = scmp.lt.s32.totalorder %s716_s14, %s716_s14 }
  0x2e   :  { %p723_p8 = por %p722_p7, %p721_p6 }
  0x30   :  { %p724_p9 = pnand %p723_p8, %p717_p5 }
  0x32   :  { %727 = shalt.err (!%p724_p9)
}
  0x33   :  { %51 = dma.hbm_to_vmem [thread:$0]  %s910_s3, 1024, %s46_s18, [#allocation6], %s781_s11, %s781_s11, %s782_s12  }
  0x34   :  { %s785_s16 = smov [#allocation8]   ;;  %s728_s21 = scalar_lea.hbm %s912_s5, 2048 }
  0x35   :  { %s59_s17 = sshll.u32 %s785_s16, 4  ;;  %p729_p10 = scmp.ne.s32.totalorder %s912_s5, %s728_s21  ;;  %s60_s17 = int_to_ptr.vmem [resolvable:$true] %s59_s17 }
  0x36   :  { %p732_p11 = scmp.lt.u32.totalorder %s728_s21, %s912_s5 }
  0x38   :  { %p734_p12 = pnand %p732_p11, %p729_p10 }
  0x3a   :  { %737 = shalt.err (!%p734_p12)
}
  0x3b   :  { %s738_s1 = scalar_lea.vmem %s60_s17, 2048  ;;  %p743_p0 = scmp.lt.s32.totalorder %s60_s17, %s60_s17 }
  0x3c   :  { %p739_p13 = scmp.ne.s32.totalorder %s60_s17, %s738_s1  ;;  %p744_p1 = scmp.lt.s32.totalorder %s738_s1, %s738_s1 }
  0x3e   :  { %p745_p2 = por %p744_p1, %p743_p0 }
  0x40   :  { %p746_p3 = pnand %p745_p2, %p739_p13 }
  0x42   :  { %749 = shalt.err (!%p746_p3)
}
  0x43   :  { %s786_s3 = smov 128   ;;  %s787_s11 = smov 8  }
  0x44   :  { %65 = dma.hbm_to_vmem [thread:$0]  %s912_s5, 2048, %s60_s17, [#allocation9], %s786_s3, %s786_s3, %s787_s11  }
  0x45   :  { %772 = dma.done.wait [#allocation3], 128  }
  0x46   :  { %773 = vsyncadd [#allocation3], 4294967168 }
  0x47   :  { %774 = dma.done.wait [#allocation6], 1152  }
  0x48   :  { %775 = vsyncadd [#allocation6], 4294966144 }
  0x49   :  { %776 = dma.done.wait [#allocation9], 2048  }
  0x4a   :  { %777 = vsyncadd [#allocation9], 4294965248  ;;  %v788_v0 = vmov 0.0   ;;  %vm789_vm0 = vmmov 0   ;;  %v605_v1 = vld [vmem:[#allocation5] sm:$0xff]   ;;  %v81_v2 = vld [vmem:[#allocation2] sm:$0xff]  ;;  %v275_v45 = vlaneseq }
  0x4b   :  { %567 = vmatprep.subr.bf16.mxu0 %v788_v0  ;;  %569 = vmatprep.mubr.msk.bf16.mxu0 %vm789_vm0, %v788_v0  ;;  %v82_v3 = vpack.c.bf16 %v81_v2, %v81_v2  ;;  %vm98_vm1 = vcmask 130048   ;;  %v606_v4 = vld [vmem:[#allocation7] sm:$0xff]   ;;  %v607_v5 = vld [vmem:[#allocation7 + $0x8] sm:$0xff]   ;;  %v608_v6 = vld [vmem:[#allocation7 + $0x10] sm:$0xff]   ;;  %v790_v36 = vmov 0  }
  0x4c   :  { %573 = vmatprep.subr.bf16.mxu1 %v788_v0  ;;  %589 = vmatprep.mubr.msk.bf16.mxu1 %vm789_vm0, %v788_v0  ;;  %v609_v7 = vld [vmem:[#allocation7 + $0x18] sm:$0xff]   ;;  %v610_v8 = vld [vmem:[#allocation7 + $0x20] sm:$0xff]   ;;  %v611_v9 = vld [vmem:[#allocation7 + $0x28] sm:$0xff]   ;;  %v276_v46 = vshrl.u32 %v275_v45, 7  ;;  %v407_v47 = vand.u32 127, %v275_v45 }
  0x4d   :  { %568 = vmatpush3.bf16.msra.mxu0 %v605_v1  ;;  %574 = vmatpush3.bf16.msra.mxu1 %v606_v4  ;;  %v612_v10 = vld [vmem:[#allocation7 + $0x30] sm:$0xff]   ;;  %v613_v11 = vld [vmem:[#allocation7 + $0x38] sm:$0xff]   ;;  %v614_v12 = vld [vmem:[#allocation8] ss:$8 sps:$4 sm:$0xff]  }
  0x4e   :  { %575 = vmatprep.subr.bf16.mxu1 %v788_v0  ;;  %v616_v13 = vld [vmem:[#allocation8 + $0x4] ss:$8 sps:$4 sm:$0xff]   ;;  %v619_v14 = vld [vmem:[#allocation8 + $0x14] ss:$8 sps:$4 sm:$0xff]   ;;  %v617_v15 = vld [vmem:[#allocation8 + $0x10] ss:$8 sps:$4 sm:$0xff]  }
  0x4f   :  { %365 = vmatprep.subr.bf16.mxu0 %v616_v13  ;;  %v622_v16 = vld [vmem:[#allocation8 + $0x24] ss:$8 sps:$4 sm:$0xff]   ;;  %v620_v17 = vld [vmem:[#allocation8 + $0x20] ss:$8 sps:$4 sm:$0xff]   ;;  %v625_v18 = vld [vmem:[#allocation8 + $0x34] ss:$8 sps:$4 sm:$0xff]  }
  0x50   :  { %570 = vmatmul.mubr.msk.bf16.vlgmr.msra.gmra.mrb[0].mxu0 %vm98_vm1, %v82_v3  ;;  %v623_v19 = vld [vmem:[#allocation8 + $0x30] ss:$8 sps:$4 sm:$0xff]   ;;  %v628_v20 = vld [vmem:[#allocation8 + $0x44] ss:$8 sps:$4 sm:$0xff]   ;;  %v626_v21 = vld [vmem:[#allocation8 + $0x40] ss:$8 sps:$4 sm:$0xff]  }
  0x51   :  { %576 = vmatpush3.bf16.msra.mxu1 %v607_v5  ;;  %366 = vmatpush1.bf16.msra.mxu0 %v614_v12  ;;  %v631_v22 = vld [vmem:[#allocation8 + $0x54] ss:$8 sps:$4 sm:$0xff]   ;;  %v629_v23 = vld [vmem:[#allocation8 + $0x50] ss:$8 sps:$4 sm:$0xff]   ;;  %v634_v24 = vld [vmem:[#allocation8 + $0x64] ss:$8 sps:$4 sm:$0xff]  }
  0x52   :  { %577 = vmatprep.subr.bf16.mxu1 %v788_v0  ;;  %367 = vmatprep.subr.bf16.mxu0 %v619_v14  ;;  %v632_v25 = vld [vmem:[#allocation8 + $0x60] ss:$8 sps:$4 sm:$0xff]   ;;  %v528_v26 = vld [vmem:[%s909_s2] ss:$0 sm:$0xff]  ;;  %v637_v34 = vld [vmem:[#allocation8 + $0x74] ss:$8 sps:$4 sm:$0xff]  }
  0x53   :  { %v635_v35 = vld [vmem:[#allocation8 + $0x70] ss:$8 sps:$4 sm:$0xff]   ;;  %397 = vmatprep.mubr.bf16.mxu0 %v790_v36  ;;  %v277_v48 = vsub.s32 0, %v276_v46  ;;  %v281_v50 = vsub.s32 1, %v276_v46  ;;  %v408_v51 = vadd.s32 128, %v407_v47  ;;  %vm434_vm2 = vcmp.ge.s32.totalorder %v407_v47, 51 }
  0x54   :  { %v531_v37 = vld [vmem:[%s911_s4] ss:$0 sm:$0xff]  ;;  %vm436_vm3 = vcmp.lt.s32.totalorder %v407_v47, 102  ;;  %vm411_vm4 = vcmp.lt.s32.totalorder %v407_v47, 51  ;;  %vm459_vm5 = vcmp.ge.s32.totalorder %v407_v47, 102  ;;  %s791_s4 = smov [#allocation10]  }
  0x55   :  { %578 = vmatpush3.bf16.msra.mxu1 %v608_v6  ;;  %368 = vmatpush1.bf16.msra.mxu0 %v617_v15  ;;  %v273_v49 = vld [vmem:[%s913_s6] sm:$0x3]  ;;  %vm485_vm6 = vcmp.ge.s32.totalorder %v408_v51, 153  ;;  %vm487_vm7 = vcmp.lt.s32.totalorder %v408_v51, 204  ;;  %vm462_vm8 = vcmp.lt.s32.totalorder %v408_v51, 153  ;;  %vm438_vm9 = vmand %vm434_vm2, %vm436_vm3  ;;  %s517_s6 = sshll.u32 %s791_s4, 4  ;;  %s518_s6 = int_to_ptr.vmem [resolvable:$true] %s517_s6 }
  0x56   :  { %579 = vmatprep.subr.bf16.mxu1 %v788_v0  ;;  %369 = vmatprep.subr.bf16.mxu0 %v622_v16  ;;  %v278_v52 = vrot.slane %v273_v49, %v277_v48  ;;  %v282_v53 = vrot.slane %v273_v49, %v281_v50  ;;  %vm489_vm10 = vmand %vm485_vm6, %vm487_vm7  ;;  %s750_s30 = scalar_lea.vmem %s518_s6, 256  ;;  %p755_p5 = scmp.lt.s32.totalorder %s518_s6, %s518_s6 }
  0x57   :  { %p751_p4 = scmp.ne.s32.totalorder %s518_s6, %s750_s30  ;;  %p756_p6 = scmp.lt.s32.totalorder %s750_s30, %s750_s30 }
  0x59   :  { %580 = vmatpush3.bf16.msra.mxu1 %v609_v7  ;;  %370 = vmatpush1.bf16.msra.mxu0 %v620_v17  ;;  %p757_p7 = por %p756_p6, %p755_p5 }
  0x5a   :  { %581 = vmatprep.subr.bf16.mxu1 %v788_v0  ;;  %371 = vmatprep.subr.bf16.mxu0 %v625_v18 }
  0x5b   :  { %p758_p8 = pnand %p757_p7, %p751_p4 }
  0x5d   :  { %582 = vmatpush3.bf16.msra.mxu1 %v610_v8  ;;  %372 = vmatpush1.bf16.msra.mxu0 %v623_v19 }
  0x5e   :  { %583 = vmatprep.subr.bf16.mxu1 %v788_v0  ;;  %373 = vmatprep.subr.bf16.mxu0 %v628_v20 }
  0x61   :  { %584 = vmatpush3.bf16.msra.mxu1 %v611_v9  ;;  %374 = vmatpush1.bf16.msra.mxu0 %v626_v21 }
  0x62   :  { %585 = vmatprep.subr.bf16.mxu1 %v788_v0  ;;  %375 = vmatprep.subr.bf16.mxu0 %v631_v22 }
  0x65   :  { %586 = vmatpush3.bf16.msra.mxu1 %v612_v10  ;;  %376 = vmatpush1.bf16.msra.mxu0 %v629_v23 }
  0x66   :  { %587 = vmatprep.subr.bf16.mxu1 %v788_v0  ;;  %377 = vmatprep.subr.bf16.mxu0 %v634_v24 }
  0x69   :  { %588 = vmatpush3.bf16.msra.mxu1 %v613_v11  ;;  %378 = vmatpush1.bf16.msra.mxu0 %v632_v25 }
  0x6a   :  { %379 = vmatprep.subr.bf16.mxu0 %v637_v34 }
  0x6d   :  { %380 = vmatpush1.bf16.msra.mxu0 %v635_v35 }
 0x123   :  { %v136_v27 = vpop.f32.mrb[0].mxu0 }
 0x124   :  { %v137_v28 = vadd.f32 %v528_v26, %v136_v27  ;;  %v571_v29 = vpop.f32.mrb[1].mxu0 }
 0x125   :  { %v139_v30 = vpop.f32.mrb[2].mxu0 }
 0x126   :  { %v142_v31 = vmax.f32 %v137_v28, 0.0  ;;  %v572_v32 = vpop.f32.mrb[3].mxu0 }
 0x128   :  { %v143_v33 = vpack.c.bf16 %v142_v31, %v142_v31 }
 0x12a   :  { %590 = vmatmul.mubr.bf16.vlgmr.msra.gmra.mrb[0].mxu1 %v143_v33 }
 0x1fd   :  { %v249_v38 = vpop.f32.mrb[0].mxu1 }
 0x1fe   :  { %v250_v39 = vadd.f32 %v531_v37, %v249_v38  ;;  %v591_v40 = vpop.f32.mrb[1].mxu1 }
 0x1ff   :  { %v252_v41 = vpop.f32.mrb[2].mxu1 }
 0x200   :  { %v255_v42 = vmax.f32 %v250_v39, 0.0  ;;  %v592_v43 = vpop.f32.mrb[3].mxu1 }
 0x202   :  { %v256_v44 = vpack.c.bf16 %v255_v42, %v255_v42 }
 0x204   :  { %398 = vmatmul.mubr.bf16.vlgmr.msra.gmra.mrb[4].mxu0 %v256_v44 }
 0x2d7   :  { %v399_v54 = vpop.f32.mrb[4].mxu0 }
 0x2d8   :  { %v400_v55 = vadd.f32 %v399_v54, %v278_v52  ;;  %v401_v56 = vpop.f32.mrb[5].mxu0 }
 0x2d9   :  { %v402_v57 = vadd.f32 %v401_v56, %v282_v53  ;;  %v403_v58 = vpop.f32.mrb[6].mxu0 }
 0x2da   :  { %v404_v59 = vpop.f32.mrb[7].mxu0  ;;  %v415_v60 = vsel %vm411_vm4, %v400_v55, -1e+30  ;;  %v465_v61 = vsel %vm459_vm5, %v400_v55, -1e+30 }
 0x2db   :  { %v417_v62 = vmax.f32 %v415_v60, -1e+30  ;;  %v466_v63 = vsel %vm462_vm8, %v402_v57, -1e+30  ;;  %v440_v1 = vsel %vm438_vm9, %v400_v55, -1e+30 }
 0x2dc   :  { %v467_v0 = vmax.f32 %v465_v61, %v466_v63  ;;  %v491_v2 = vsel %vm489_vm10, %v402_v57, -1e+30  ;;  %v442_v3 = vmax.f32 %v440_v1, -1e+30 }
 0x2dd   :  { %418 = vmax.xlane.f32.xlu0 %v417_v62  ;;  %v492_v4 = vmax.f32 %v491_v2, -1e+30 }
 0x2de   :  { %468 = vmax.xlane.f32.xlu1 %v467_v0 }
 0x2e1   :  { %443 = vmax.xlane.f32.xlu0 %v442_v3 }
 0x2e2   :  { %493 = vmax.xlane.f32.xlu1 %v492_v4 }
 0x36a   :  { %v419_v5 = vpop.xlane.xlu0 %418 }
 0x36b   :  { %v420_v6 = vsub.f32 %v415_v60, %v419_v5  ;;  %v421_v7 = vsub.f32 -1e+30, %v419_v5  ;;  %v469_v8 = vpop.xlane.xlu1 %468 }
 0x36c   :  { %v470_v9 = vsub.f32 %v465_v61, %v469_v8  ;;  %v471_v10 = vsub.f32 %v466_v63, %v469_v8 }
 0x36d   :  { %v422_v11 = vmul.f32 1.442695, %v420_v6  ;;  %v424_v12 = vmul.f32 1.442695, %v421_v7 }
 0x36e   :  { %v472_v13 = vmul.f32 1.442695, %v470_v9  ;;  %v474_v14 = vmul.f32 1.442695, %v471_v10  ;;  %v444_v15 = vpop.xlane.xlu0 %443 }
 0x36f   :  { %638 = vpow2.f32 %v422_v11  ;;  %v445_v16 = vsub.f32 %v440_v1, %v444_v15  ;;  %v446_v17 = vsub.f32 -1e+30, %v444_v15  ;;  %v494_v18 = vpop.xlane.xlu1 %493 }
 0x370   :  { %640 = vpow2.f32 %v424_v12  ;;  %v495_v19 = vsub.f32 -1e+30, %v494_v18  ;;  %v496_v20 = vsub.f32 %v491_v2, %v494_v18 }
 0x371   :  { %642 = vpow2.f32 %v472_v13  ;;  %v447_v21 = vmul.f32 1.442695, %v445_v16  ;;  %v449_v22 = vmul.f32 1.442695, %v446_v17 }
 0x372   :  { %644 = vpow2.f32 %v474_v14  ;;  %v497_v23 = vmul.f32 1.442695, %v495_v19  ;;  %v499_v24 = vmul.f32 1.442695, %v496_v20 }
 0x373   :  { %646 = vpow2.f32 %v447_v21 }
 0x374   :  { %648 = vpow2.f32 %v449_v22 }
 0x375   :  { %650 = vpow2.f32 %v497_v23 }
 0x376   :  { %652 = vpow2.f32 %v499_v24 }
 0x379   :  { %v639_v25 = vpop.eup %638 }
 0x37a   :  { %v641_v26 = vpop.eup %640 }
 0x37b   :  { %v643_v27 = vpop.eup %642  ;;  %v426_v28 = vadd.f32 %v641_v26, %v639_v25 }
 0x37c   :  { %v645_v29 = vpop.eup %644 }
 0x37d   :  { %v647_v30 = vpop.eup %646  ;;  %427 = vadd.xlane.f32.xlu0 %v426_v28  ;;  %v476_v33 = vadd.f32 %v645_v29, %v643_v27 }
 0x37e   :  { %v649_v31 = vpop.eup %648 }
 0x37f   :  { %v651_v32 = vpop.eup %650  ;;  %v451_v34 = vadd.f32 %v649_v31, %v647_v30 }
 0x380   :  { %v653_v35 = vpop.eup %652 }
 0x381   :  { %477 = vadd.xlane.f32.xlu0 %v476_v33  ;;  %452 = vadd.xlane.f32.xlu1 %v451_v34  ;;  %v501_v36 = vadd.f32 %v653_v35, %v651_v32 }
 0x385   :  { %502 = vadd.xlane.f32.xlu1 %v501_v36 }
 0x40a   :  { %v428_v37 = vpop.xlane.xlu0 %427 }
 0x40b   :  { %654 = vrcp.f32 %v428_v37 }
 0x40e   :  { %v453_v38 = vpop.xlane.xlu1 %452  ;;  %v478_v39 = vpop.xlane.xlu0 %477 }
 0x40f   :  { %656 = vrcp.f32 %v453_v38 }
 0x410   :  { %658 = vrcp.f32 %v478_v39 }
 0x412   :  { %v503_v40 = vpop.xlane.xlu1 %502 }
 0x413   :  { %660 = vrcp.f32 %v503_v40 }
 0x415   :  { %v655_v41 = vpop.eup %654 }
 0x416   :  { %v430_v44 = vmul.f32 %v655_v41, %v639_v25  ;;  %v431_v45 = vmul.f32 %v655_v41, %v641_v26 }
 0x419   :  { %v657_v42 = vpop.eup %656 }
 0x41a   :  { %v659_v43 = vpop.eup %658  ;;  %v455_v46 = vmul.f32 %v657_v42, %v647_v30  ;;  %v456_v47 = vmul.f32 %v657_v42, %v649_v31 }
 0x41b   :  { %v480_v50 = vmul.f32 %v659_v43, %v643_v27  ;;  %v481_v51 = vmul.f32 %v659_v43, %v645_v29 }
 0x41c   :  { %v457_v48 = vadd.f32 %v455_v46, %v430_v44  ;;  %v458_v49 = vadd.f32 %v456_v47, %v431_v45 }
 0x41d   :  { %v661_v52 = vpop.eup %660 }
 0x41e   :  { %v482_v53 = vadd.f32 %v480_v50, %v457_v48  ;;  %v483_v54 = vadd.f32 %v481_v51, %v458_v49  ;;  %v505_v55 = vmul.f32 %v661_v52, %v651_v32  ;;  %v506_v56 = vmul.f32 %v661_v52, %v653_v35 }
 0x420   :  { %v507_v57 = vadd.f32 %v505_v55, %v482_v53  ;;  %v508_v58 = vadd.f32 %v506_v56, %v483_v54 }
 0x422   :  { %509 = vst [vmem:[#allocation10] sm:$0xff] %v507_v57  ;;  %510 = vst [vmem:[#allocation10 + $0x8] sm:$0xff] %v508_v58 }
 0x423   :  { %761 = shalt.err (!%p758_p8)
}
 0x424   :  { %s762_s10 = scalar_lea.hbm %s914_s7, 256 }
 0x425   :  { %p763_p9 = scmp.ne.s32.totalorder %s914_s7, %s762_s10  ;;  %p766_p10 = scmp.lt.u32.totalorder %s762_s10, %s914_s7 }
 0x427   :  { %p768_p11 = pnand %p766_p10, %p763_p9 }
 0x429   :  { %771 = shalt.err (!%p768_p11)
}
 0x42a   :  { %520 = dma.vmem_to_hbm [thread:$0]  %s518_s6, 256, %s914_s7, [#allocation4]  }
 0x42b   :  { %778 = dma.done.wait [#allocation4], 256  }
 0x42c   :  { %779 = vsyncadd [#allocation4], 4294967040 }
 0x42d   :  { %524 = vsyncpa [#allocation3], 1 }
 0x42e   :  { %525 = vsyncpa [#allocation6], 1 }
 0x42f   :  { %526 = vsyncpa [#allocation9], 1 }
 0x430   :  { %527 = vsyncpa [#allocation4], 1 }

</bundles_post_ra>
